<compile_context>
chip_gen: v6e
topology: v6e:2x2x1
jax: 0.10.0
libtpu: 0.0.40
codegen_flags: <defaults>
</compile_context>

<pallas_src>
import jax
import jax.numpy as jnp
from jax.experimental import pallas as pl
from jax.experimental.pallas import tpu as pltpu


# ----------------------------------------------------------------------------
# Kernel
# ----------------------------------------------------------------------------
def _conv_rows_kernel(x_ref, w_ref, b_ref, o_ref):
    """One (batch image, output-row tile) step of the convolution.

    x_ref: (H, W*Cin)          one input image, rows resident in VMEM
    w_ref: (KH, W*Cin, OW*Cout) banded weight (constant across the grid)
    b_ref: (1, OW*Cout)         bias tiled over output columns
    o_ref: (TOH, OW*Cout)       lane-dense output row tile
    """
    toh = o_ref.shape[0]
    r0 = pl.program_id(1) * toh  # first output row of this tile

    acc = jnp.zeros(o_ref.shape, jnp.float32)
    for kh in range(w_ref.shape[0]):  # static, unrolled (KH = 3)
        xs = x_ref[pl.ds(r0 + kh, toh), :]          # (TOH, W*Cin)
        acc = acc + jnp.dot(xs, w_ref[kh],
                            preferred_element_type=jnp.float32)
    o_ref[...] = (acc + b_ref[...]).astype(o_ref.dtype)


def _pick_row_tile(oh, max_rows=512):
    """Row-tile size: full OH if small, else a multiple of 8 dividing OH."""
    if oh <= max_rows:
        return oh
    t = (max_rows // 8) * 8
    while t >= 8:
        if oh % t == 0:
            return t
        t -= 8
    return oh  # fallback: single block


# ----------------------------------------------------------------------------
# Wrapper
# ----------------------------------------------------------------------------
def conv2d_pallas(x, w_banded, bias_tiled, *, KH, KW, Cout):
    """Conv2d (stride=1, no padding) as a row-tiled Pallas matmul.

    x:          (N, Cin, H, W)            float32, NCHW
    w_banded:   (KH, W*Cin, OW*Cout)      pre-baked banded weight
    bias_tiled: (1, OW*Cout)              bias tiled over OW
    returns     (N, Cout, OH, OW)         float32, NCHW
    """
    N, Cin, H, W = x.shape
    OH, OW = H - KH + 1, W - KW + 1
    WC = W * Cin
    OWC = OW * Cout
    assert w_banded.shape == (KH, WC, OWC)
    assert bias_tiled.shape == (1, OWC)

    TOH = _pick_row_tile(OH)
    n_row_blocks = OH // TOH

    # Glue: single NCHW -> (N, H, W*Cin) relayout of the input (read once).
    x_rows = jnp.transpose(x, (0, 2, 3, 1)).reshape(N, H, WC)

    flops = 2 * N * OH * KH * WC * OWC
    bytes_accessed = 4 * (x_rows.size + w_banded.size + bias_tiled.size
                          + N * OH * OWC)

    out = pl.pallas_call(
        _conv_rows_kernel,
        out_shape=jax.ShapeDtypeStruct((N, OH, OWC), jnp.float32),
        grid_spec=pltpu.PrefetchScalarGridSpec(
            num_scalar_prefetch=0,
            grid=(N, n_row_blocks),
            in_specs=[
                # one image per batch index; stays resident across row blocks
                pl.BlockSpec((None, H, WC), lambda n, i: (n, 0, 0)),
                # banded weight: constant -> fetched once, VMEM resident
                pl.BlockSpec((KH, WC, OWC), lambda n, i: (0, 0, 0)),
                # tiled bias: constant
                pl.BlockSpec((1, OWC), lambda n, i: (0, 0)),
            ],
            out_specs=pl.BlockSpec((None, TOH, OWC), lambda n, i: (n, i, 0)),
        ),
        compiler_params=pltpu.CompilerParams(
            dimension_semantics=("parallel", "parallel")),
        cost_estimate=pl.CostEstimate(
            flops=flops, transcendentals=0, bytes_accessed=bytes_accessed),
    )(x_rows, w_banded, bias_tiled)

    # Glue: back to NCHW.
    out = out.reshape(N, OH, OW, Cout)
    return jnp.transpose(out, (0, 3, 1, 2))


# ----------------------------------------------------------------------------
# Module
# ----------------------------------------------------------------------------
class YNPallas:
    """JAX/Pallas equivalent of the PyTorch `YN` module (Conv2d(3, 64, 3))."""

    def __init__(self, key):
        kw, kb = jax.random.split(key)
        Cout, Cin, KH, KW = 64, 3, 3, 3
        fan_in = Cin * KH * KW
        bound = 1.0 / (fan_in ** 0.5)  # PyTorch default init bounds
        self.weight = jax.random.uniform(
            kw, (Cout, Cin, KH, KW), jnp.float32, -bound, bound)
        self.bias = jax.random.uniform(kb, (Cout,), jnp.float32, -bound, bound)
        self.Cout, self.Cin, self.KH, self.KW = Cout, Cin, KH, KW
        self._packed_cache = {}  # (H, W) -> (w_banded, bias_tiled)

    def _packed(self, H, W):
        """Build (once per spatial shape) the banded weight + tiled bias."""
        key = (H, W)
        if key not in self._packed_cache:
            Cout, Cin, KH, KW = self.Cout, self.Cin, self.KH, self.KW
            OW = W - KW + 1
            # delta[w, ow, kw] = 1 if w == ow + kw
            w_idx = jnp.arange(W)[:, None, None]
            ow_idx = jnp.arange(OW)[None, :, None]
            kw_idx = jnp.arange(KW)[None, None, :]
            delta = (w_idx == ow_idx + kw_idx).astype(jnp.float32)  # (W,OW,KW)
            # weight (Cout, Cin, KH, KW) -> (KH, KW, Cin, Cout)
            w_t = jnp.transpose(self.weight, (2, 3, 1, 0))
            # Wb[kh, w*Cin+ci, ow*Cout+co] = weight[co, ci, kh, w-ow] (banded)
            w_banded = jnp.einsum("wok,hkcd->hwcod", delta, w_t)
            w_banded = w_banded.reshape(KH, W * Cin, OW * Cout)
            bias_tiled = jnp.tile(self.bias, OW).reshape(1, OW * Cout)
            self._packed_cache[key] = (w_banded, bias_tiled)
        return self._packed_cache[key]

    def __call__(self, x):
        N, C, H, W = x.shape
        assert C == self.Cin
        w_banded, bias_tiled = self._packed(H, W)
        return conv2d_pallas(x, w_banded, bias_tiled,
                             KH=self.KH, KW=self.KW, Cout=self.Cout)


# ----------------------------------------------------------------------------
# Main
# ----------------------------------------------------------------------------
if __name__ == "__main__":
    key = jax.random.PRNGKey(0)
    k_param, k_x = jax.random.split(key)

    model = YNPallas(k_param)

    # Small deterministic input consistent with Conv2d(3, 64, kernel_size=3).
    x = jax.random.normal(k_x, (2, 3, 16, 16), jnp.float32)

    y = model(x)
    y = jax.block_until_ready(y)
    assert y.shape == (2, 64, 14, 14), y.shape

    # Sanity check against XLA's native conv.
    y_ref = jax.lax.conv_general_dilated(
        x, model.weight, window_strides=(1, 1), padding="VALID",
        dimension_numbers=("NCHW", "OIHW", "NCHW"),
    ) + model.bias.reshape(1, 64, 1, 1)
    assert jnp.allclose(y, y_ref, atol=1e-3, rtol=1e-3), (
        float(jnp.max(jnp.abs(y - y_ref))))

    print("KERNEL_OK")
</pallas_src>

<mosaic_0001>
module attributes {stable_mosaic.version = 11 : i64} {
  func.func @_conv_rows_kernel(%arg0: i32, %arg1: i32, %arg2: memref<1x16x48xf32, #tpu.memory_space<vmem>>, %arg3: memref<3x48x896xf32, #tpu.memory_space<vmem>>, %arg4: memref<1x896xf32, #tpu.memory_space<vmem>>, %arg5: memref<1x14x896xf32, #tpu.memory_space<vmem>>) attributes {dimension_semantics = [#tpu.dimension_semantics<parallel>, #tpu.dimension_semantics<parallel>], iteration_bounds = array<i64: 2, 1>, scalar_prefetch = 0 : i64, scratch_operands = 0 : i64, tpu.core_type = #tpu.core_type<tc>, window_params = [{transform_indices = @transform_0, window_bounds = array<i64: 1, 16, 48>}, {pipeline_mode = #tpu.pipeline_mode<synchronous>, transform_indices = @transform_1, window_bounds = array<i64: 3, 48, 896>}, {pipeline_mode = #tpu.pipeline_mode<synchronous>, transform_indices = @transform_2, window_bounds = array<i64: 1, 896>}, {transform_indices = @transform_3, window_bounds = array<i64: 1, 14, 896>}]} {
    %c14_i32 = arith.constant 14 : i32
    %0 = arith.muli %arg1, %c14_i32 : i32
    %cst = arith.constant 0.000000e+00 : f32
    %1 = vector.broadcast %cst : f32 to vector<14x896xf32>
    %c0_i32 = arith.constant 0 : i32
    %2 = arith.addi %0, %c0_i32 : i32
    %c0 = arith.constant 0 : index
    %3 = arith.index_cast %2 : i32 to index
    %c0_0 = arith.constant 0 : index
    %4 = vector.load %arg2[%c0, %3, %c0_0] : memref<1x16x48xf32, #tpu.memory_space<vmem>>, vector<1x14x48xf32>
    %5 = vector.shape_cast %4 : vector<1x14x48xf32> to vector<14x48xf32>
    %c0_1 = arith.constant 0 : index
    %c0_2 = arith.constant 0 : index
    %c0_3 = arith.constant 0 : index
    %6 = vector.load %arg3[%c0_1, %c0_2, %c0_3] : memref<3x48x896xf32, #tpu.memory_space<vmem>>, vector<1x48x896xf32>
    %7 = vector.shape_cast %6 : vector<1x48x896xf32> to vector<48x896xf32>
    %cst_4 = arith.constant dense<0.000000e+00> : vector<14x896xf32>
    %8 = tpu.matmul %5, %7, %cst_4 {dimension_numbers = #tpu.dot_dimension_numbers<[1], [0], [0], [1], [0, 0, 1, 1], [], []>} : vector<14x48xf32>, vector<48x896xf32>, vector<14x896xf32> -> vector<14x896xf32>
    %9 = arith.addf %1, %8 : vector<14x896xf32>
    %c1_i32 = arith.constant 1 : i32
    %10 = arith.addi %0, %c1_i32 : i32
    %c0_5 = arith.constant 0 : index
    %11 = arith.index_cast %10 : i32 to index
    %c0_6 = arith.constant 0 : index
    %12 = vector.load %arg2[%c0_5, %11, %c0_6] : memref<1x16x48xf32, #tpu.memory_space<vmem>>, vector<1x14x48xf32>
    %13 = vector.shape_cast %12 : vector<1x14x48xf32> to vector<14x48xf32>
    %c1 = arith.constant 1 : index
    %c0_7 = arith.constant 0 : index
    %c0_8 = arith.constant 0 : index
    %14 = vector.load %arg3[%c1, %c0_7, %c0_8] : memref<3x48x896xf32, #tpu.memory_space<vmem>>, vector<1x48x896xf32>
    %15 = vector.shape_cast %14 : vector<1x48x896xf32> to vector<48x896xf32>
    %cst_9 = arith.constant dense<0.000000e+00> : vector<14x896xf32>
    %16 = tpu.matmul %13, %15, %cst_9 {dimension_numbers = #tpu.dot_dimension_numbers<[1], [0], [0], [1], [0, 0, 1, 1], [], []>} : vector<14x48xf32>, vector<48x896xf32>, vector<14x896xf32> -> vector<14x896xf32>
    %17 = arith.addf %9, %16 : vector<14x896xf32>
    %c2_i32 = arith.constant 2 : i32
    %18 = arith.addi %0, %c2_i32 : i32
    %c0_10 = arith.constant 0 : index
    %19 = arith.index_cast %18 : i32 to index
    %c0_11 = arith.constant 0 : index
    %20 = vector.load %arg2[%c0_10, %19, %c0_11] : memref<1x16x48xf32, #tpu.memory_space<vmem>>, vector<1x14x48xf32>
    %21 = vector.shape_cast %20 : vector<1x14x48xf32> to vector<14x48xf32>
    %c2 = arith.constant 2 : index
    %c0_12 = arith.constant 0 : index
    %c0_13 = arith.constant 0 : index
    %22 = vector.load %arg3[%c2, %c0_12, %c0_13] : memref<3x48x896xf32, #tpu.memory_space<vmem>>, vector<1x48x896xf32>
    %23 = vector.shape_cast %22 : vector<1x48x896xf32> to vector<48x896xf32>
    %cst_14 = arith.constant dense<0.000000e+00> : vector<14x896xf32>
    %24 = tpu.matmul %21, %23, %cst_14 {dimension_numbers = #tpu.dot_dimension_numbers<[1], [0], [0], [1], [0, 0, 1, 1], [], []>} : vector<14x48xf32>, vector<48x896xf32>, vector<14x896xf32> -> vector<14x896xf32>
    %25 = arith.addf %17, %24 : vector<14x896xf32>
    %c0_15 = arith.constant 0 : index
    %c0_16 = arith.constant 0 : index
    %26 = vector.load %arg4[%c0_15, %c0_16] : memref<1x896xf32, #tpu.memory_space<vmem>>, vector<1x896xf32>
    %27 = vector.broadcast %26 : vector<1x896xf32> to vector<14x896xf32>
    %28 = arith.addf %25, %27 : vector<14x896xf32>
    %c0_17 = arith.constant 0 : index
    %c0_18 = arith.constant 0 : index
    %c0_19 = arith.constant 0 : index
    %29 = vector.load %arg5[%c0_17, %c0_18, %c0_19] : memref<1x14x896xf32, #tpu.memory_space<vmem>>, vector<1x14x896xf32>
    %30 = vector.shape_cast %29 : vector<1x14x896xf32> to vector<14x896xf32>
    %31 = vector.shape_cast %28 : vector<14x896xf32> to vector<1x14x896xf32>
    tpu.vector_store %arg5[%c0_17, %c0_18, %c0_19], %31 {strides = array<i32>} : memref<1x14x896xf32, #tpu.memory_space<vmem>>, vector<1x14x896xf32>,
    return
  }
  func.func @transform_0(%arg0: i32, %arg1: i32) -> (i32, i32, i32) {
    %c0_i32 = arith.constant 0 : i32
    %c0_i32_0 = arith.constant 0 : i32
    %c0_i32_1 = arith.constant 0 : i32
    return %arg0, %c0_i32, %c0_i32_0 : i32, i32, i32
  }
  func.func @transform_1(%arg0: i32, %arg1: i32) -> (i32, i32, i32) {
    %c0_i32 = arith.constant 0 : i32
    %c0_i32_0 = arith.constant 0 : i32
    %c0_i32_1 = arith.constant 0 : i32
    %c0_i32_2 = arith.constant 0 : i32
    return %c0_i32, %c0_i32_0, %c0_i32_1 : i32, i32, i32
  }
  func.func @transform_2(%arg0: i32, %arg1: i32) -> (i32, i32) {
    %c0_i32 = arith.constant 0 : i32
    %c0_i32_0 = arith.constant 0 : i32
    %c0_i32_1 = arith.constant 0 : i32
    return %c0_i32, %c0_i32_0 : i32, i32
  }
  func.func @transform_3(%arg0: i32, %arg1: i32) -> (i32, i32, i32) {
    %c0_i32 = arith.constant 0 : i32
    %c0_i32_0 = arith.constant 0 : i32
    return %arg0, %arg1, %c0_i32 : i32, i32, i32
  }
}

</mosaic_0001>

<bundles_post_ra>
// kernel: tpu_custom_call.1
= control target key start
LH: loop header
LB: loop body
LE: loop exit
PB: predicated region body
PF: predicated region fallthrough
CT: control target
= control target key end

     0   :  { %8 = vsyncpa [#allocation3], 0  ;;  %s2129_s0 = inlined_call_operand.hbm [shape: f32[2,16,48], index: 0, kind: input, shape index: {}]   ;;  %s2130_s1 = inlined_call_operand.hbm [shape: f32[3,48,896], index: 1, kind: input, shape index: {}]   ;;  %s2131_s2 = inlined_call_operand.hbm [shape: f32[1,896], index: 2, kind: input, shape index: {}]   ;;  %s2132_s3 = inlined_call_operand.vmem [shape: f32[2,14,896], index: 3, kind: output, shape index: {}]  }
   0x1   :  { %10 = vsyncpa [#allocation3 + $0x1], 0 }
   0x2   :  { %11 = vsyncpa [#allocation5], 0  ;;  %s1884_s12 = smov 0   ;;  %s1886_s13 = smov 0  }
   0x3   :  { %s1888_s14 = smov 0   ;;  %s1890_s15 = smov 0  }
   0x4   :  { %s1892_s16 = smov 0   ;;  %s1894_s17 = smov 0  }
   0x5 LB: > { %s1524_s18 = sadd.s32 4294967295, %s1854_s17   ;;  %p49_p0 = scmp.ne.s32.totalorder %s1838_s13, %s1834_s12  ;;  %s1854_s17 = sphi %s1894_s17, %s17_s17   ;;  %s1850_s16 = sphi %s1892_s16, %s2142_s16   ;;  %s1846_s15 = sphi %s1890_s15, %s2141_s15   ;;  %s1842_s14 = sphi %s1888_s14, %s2140_s14   ;;  %s1838_s13 = sphi %s1886_s13, %s2139_s13   ;;  %s1834_s12 = sphi %s1884_s12, %s2138_s12  }
   0x6   : > { %p1914_p1 = scmp.eq.s32.totalorder %s1524_s18, 0  ;;  %p1526_p2 = scmp.ge.s32.totalorder %s1854_s17, 1 }
   0x7   : > { %p130_p3 = scmp.lt.s32.totalorder %s1854_s17, 3  ;;  %s1856_s22 = smov [#allocation4]  }
   0x8   : > { %p1922_p4 = por %p1914_p1, %p49_p0  ;;  %s142_s23 = sshll.u32 %s1856_s22, 4  ;;  %s143_s23 = int_to_ptr.vmem [resolvable:$true] %s142_s23 }
   0x9   : > { %p1926_p5 = pnand %p1526_p2, %p130_p3  ;;  %s1857_s25 = smov [#allocation6]  }
   0xa   : > { %s156_s26 = sshll.u32 %s1857_s25, 4  ;;  %s1731_s27 = scalar_lea.vmem %s143_s23, 16128  ;;  %s157_s26 = int_to_ptr.vmem [resolvable:$true] %s156_s26 }
   0xb   : > { %p1649_p6 = pneg %p1926_p5  ;;  %p1732_p9 = scmp.ne.s32.totalorder %s143_s23, %s1731_s27 }
   0xc   : > { %p1739_p12 = scmp.lt.s32.totalorder %s143_s23, %s143_s23  ;;  %p1740_p13 = scmp.lt.s32.totalorder %s1731_s27, %s1731_s27 }
   0xd   : > { %p1934_p7 = pnand %p1649_p6, %p1914_p1 }
   0xe   : > { %p1741_p0 = por %p1740_p13, %p1739_p12 }
   0xf   : > { %p1722_p8 = pneg %p1934_p7 }
  0x11   : > { %p1734_p10 = pnand %p1732_p9, %p1722_p8 }
  0x13   : > { %p1735_p11 = pneg %p1734_p10 }
  0x15   : > { %p1742_p2 = pnand %p1741_p0, %p1735_p11 }
  0x17   : > { %1745 = shalt.err (!%p1742_p2)
}
  0x18   : > { %s1858_s28 = smov 896   ;;  %s1859_s29 = smov 56  }
  0x19   : > { %1652 = dma.hbm_to_vmem [thread:$0]  (!%p1934_p7), %s2130_s1, 16128, %s143_s23, [#allocation5], %s1858_s28, %s1858_s28, %s1859_s29  }
  0x1a   : > { %s1757_s5 = scalar_lea.vmem %s157_s26, 112  ;;  %s1764_s6 = scalar_lea.vmem %s157_s26, 128 }
  0x1b   : > { %p1758_p3 = scmp.ne.s32.totalorder %s157_s26, %s1757_s5  ;;  %p1765_p10 = scmp.lt.s32.totalorder %s157_s26, %s157_s26 }
  0x1c   : > { %p1766_p12 = scmp.lt.s32.totalorder %s1764_s6, %s1757_s5 }
  0x1d   : > { %p1760_p6 = pnand %p1758_p3, %p1722_p8 }
  0x1e   : > { %p1767_p11 = por %p1766_p12, %p1765_p10 }
  0x1f   : > { %p1761_p9 = pneg %p1760_p6 }
  0x21   : > { %p1768_p13 = pnand %p1767_p11, %p1761_p9 }
  0x23   : > { %1771 = shalt.err (!%p1768_p13)
}
  0x24   : > { %1655 = dma.hbm_to_vmem [thread:$0]  (!%p1934_p7), %s2131_s2, 112, %s157_s26, [#allocation5]  }
  0x25   : > { %s29_s9 = sadd.s32 1, %s1850_s16  ;;  %s36_s10 = sadd.s32 1, %s1842_s14 }
  0x26   : > { %p31_p8 = scmp.ge.s32.totalorder %s29_s9, 2  ;;  %p43_p0 = scmp.ne.s32.totalorder %s1842_s14, %s1838_s13 }
  0x27   : > { %p44_p2 = scmp.eq.s32.totalorder %s1854_s17, 0  ;;  %p1662_p3 = scmp.lt.s32.totalorder %s1854_s17, 2 }
  0x28   : > { %s2144_s9 = smov (%p31_p8, %s29_s9), 0  ;;  %s167_s11 = sand.u32 1, %s1842_s14  }
  0x29   : > { %p45_p6 = por %p44_p2, %p43_p0  ;;  %s33_s12 = ssub.s32 %s1850_s16, %s2144_s9 }
  0x2a   : > { %p34_p9 = scmp.eq.s32.totalorder %s33_s12, 0  ;;  %s1530_s18 = sshll.u32 %s167_s11, 4 }
  0x2b   : > { %s1568_s22 = sshll.u32 %s1850_s16, 8  ;;  %s171_s27 = scalar_lea.vmem [#allocation2], %s1530_s18 }
  0x2c   : > { %s1969_s23 = scalar_select %p34_p9, %s1842_s14, %s36_s10  }
  0x2d   : > { %s177_s26 = scalar_lea.hbm %s2129_s0, %s1568_s22  ;;  %s178_s28 = sshll.u32 %s171_s27, 4  ;;  %s179_s28 = int_to_ptr.vmem [resolvable:$true] %s178_s28 }
  0x2e   : > { %p1976_p7 = pnand %p1662_p3, %p45_p6  ;;  %s168_s30 = scalar_lea.sflag [#allocation3], %s167_s11 }
  0x2f   : > { %s1785_s4 = scalar_lea.vmem %s179_s28, 256  ;;  %s1860_s5 = smov [#allocation2]  }
  0x30   : > { %p1774_p10 = pneg %p1976_p7  ;;  %p1786_p12 = scmp.ne.s32.totalorder %s179_s28, %s1785_s4 }
  0x31   : > { %s1790_s6 = sshll.u32 %s1860_s5, 4  ;;  %s1791_s6 = int_to_ptr.vmem [resolvable:$false] %s1790_s6 }
  0x32   : > { %p1788_p11 = pnand %p1786_p12, %p1774_p10  ;;  %s1792_s7 = scalar_lea.vmem %s1791_s6, 512 }
  0x33   : > { %p1793_p8 = scmp.lt.s32.totalorder %s179_s28, %s1791_s6  ;;  %p1794_p0 = scmp.lt.s32.totalorder %s1792_s7, %s1785_s4 }
  0x34   : > { %p1789_p13 = pneg %p1788_p11 }
  0x35   : > { %p1795_p2 = por %p1794_p0, %p1793_p8 }
  0x37   : > { %p1796_p9 = pnand %p1795_p2, %p1789_p13 }
  0x39   : > { %1799 = shalt.err (!%p1796_p9)
}
  0x3a   : > { %s1861_s8 = smov 128   ;;  %s1862_s10 = smov 8  }
  0x3b   : > { %1659 = dma.hbm_to_vmem [thread:$0]  (!%p1976_p7), %s177_s26, 256, %s179_s28, %s168_s30, %s1861_s8, %s1861_s8, %s1862_s10  }
  0x3c   : > { %190 = sbr.rel (%p1926_p5) target bundleno = 364 (0x16c), region = 32  ;;  %s192_s11 = sand.u32 (!%p1926_p5), 1, %s1838_s13  }
  0x3d   : > { %s1534_s12 = sshll.u32 (!%p1926_p5), %s192_s11, 4  ;;  %s193_s18 = scalar_lea.sflag (!%p1926_p5), [#allocation3], %s192_s11 }
  0x3e   : > { %s1987_s22 = scalar_lea.vmem (!%p1926_p5), [#allocation2], %s1534_s12 }
  0x41   : > { %1825 = dma.done.wait (%p1922_p4), %s193_s18, 256  }
  0x42   : > { %1827 = vsyncadd (%p1922_p4), %s193_s18, 4294967040 }
  0x43   : > { %1829 = dma.done.wait (%p1914_p1), [#allocation5], 16240  }
  0x44   : > { %1831 = vsyncadd (%p1914_p1), [#allocation5], 4294951056  ;;  %v1863_v0 = vmov 0.0   ;;  %v330_v1 = vld [vmem:[#allocation4 + $0x270] sm:$0xff]  ;;  %v332_v2 = vld [vmem:[#allocation4 + $0x280] sm:$0xff]  ;;  %vm336_vm0 = vcmask 392192  }
  0x45   : > { %407 = vmatprep.mubr.f32.mxu0 %v1863_v0  ;;  %484 = vmatprep.mubr.f32.mxu1 %v1863_v0  ;;  %v329_v3 = vld [vmem:[#allocation4 + $0x268] sm:$0xff]  ;;  %v331_v4 = vld [vmem:[#allocation4 + $0x278] sm:$0xff]  ;;  %v322_v7 = vld [vmem:[#allocation4 + $0x230] sm:$0xff]  ;;  %p233_p1 = scmp.lt.s32.totalorder %s1846_s15, 1 }
  0x46   : > { %363 = vmatprep.subr.mxu0 %v330_v1  ;;  %440 = vmatprep.subr.mxu1 %v332_v2  ;;  %v323_v5 = vld [vmem:[#allocation4 + $0x238] sm:$0xff]  ;;  %v325_v6 = vld [vmem:[#allocation4 + $0x248] sm:$0xff]  ;;  %v324_v8 = vld [vmem:[#allocation4 + $0x240] sm:$0xff] }
  0x47   : > { %364 = vmatpush1.msra.mxu0 %v329_v3  ;;  %441 = vmatpush1.msra.mxu1 %v331_v4  ;;  %v316_v9 = vld [vmem:[#allocation4 + $0x200] sm:$0xff]  ;;  %v318_v10 = vld [vmem:[#allocation4 + $0x210] sm:$0xff]  ;;  %v315_v11 = vld [vmem:[#allocation4 + $0x1f8] sm:$0xff]  ;;  %s2146_s15 = smov (!%p233_p1, %s1846_s15), 1 }
  0x48   : > { %365 = vmatprep.subr.mxu0 %v323_v5  ;;  %442 = vmatprep.subr.mxu1 %v325_v6  ;;  %v317_v12 = vld [vmem:[#allocation4 + $0x208] sm:$0xff]  ;;  %v311_v14 = vld [vmem:[#allocation4 + $0x1d8] sm:$0xff]  ;;  %v308_v15 = vld [vmem:[#allocation4 + $0x1c0] sm:$0xff]  ;;  %s1638_s19 = smul.u32 112, %s2146_s15 }
  0x49   : > { %366 = vmatpush1.msra.mxu0 %v322_v7  ;;  %443 = vmatpush1.msra.mxu1 %v324_v8  ;;  %v309_v13 = vld [vmem:[#allocation4 + $0x1c8] sm:$0xff]  ;;  %v310_v16 = vld [vmem:[#allocation4 + $0x1d0] sm:$0xff]  ;;  %v304_v18 = vld [vmem:[#allocation4 + $0x1a0] sm:$0xff] }
  0x4a   : > { %367 = vmatprep.subr.mxu0 %v316_v9  ;;  %444 = vmatprep.subr.mxu1 %v318_v10  ;;  %v302_v17 = vld [vmem:[#allocation4 + $0x190] sm:$0xff]  ;;  %v301_v19 = vld [vmem:[#allocation4 + $0x188] sm:$0xff]  ;;  %v303_v20 = vld [vmem:[#allocation4 + $0x198] sm:$0xff]  ;;  %s2082_s24 = scalar_lea.vmem %s2132_s3, %s1638_s19 }
  0x4b   : > { %368 = vmatpush1.msra.mxu0 %v315_v11  ;;  %445 = vmatpush1.msra.mxu1 %v317_v12  ;;  %v295_v21 = vld [vmem:[#allocation4 + $0x158] sm:$0xff]  ;;  %v297_v22 = vld [vmem:[#allocation4 + $0x168] sm:$0xff]  ;;  %v294_v23 = vld [vmem:[#allocation4 + $0x150] sm:$0xff] }
  0x4c   : > { %369 = vmatprep.subr.mxu0 %v309_v13  ;;  %446 = vmatprep.subr.mxu1 %v311_v14  ;;  %v296_v24 = vld [vmem:[#allocation4 + $0x160] sm:$0xff]  ;;  %v334_v26 = vld [vmem:[#allocation4 + $0x290] sm:$0xff]  ;;  %v335_v27 = vld [vmem:[#allocation4 + $0x298] sm:$0xff] }
  0x4d   : > { %370 = vmatpush1.msra.mxu0 %v308_v15  ;;  %447 = vmatpush1.msra.mxu1 %v310_v16  ;;  %v1538_v25 = vld [vmem:[%s1987_s22 + $0x1] sm:$0xff]  ;;  %v2003_v37 = vld [vmem:[%s1987_s22 + $0x9] sm:$0x3f] }
  0x4e   : > { %371 = vmatprep.subr.mxu0 %v302_v17  ;;  %448 = vmatprep.subr.mxu1 %v304_v18  ;;  %v333_v28 = vld [vmem:[#allocation4 + $0x288] sm:$0xff]  ;;  %v327_v29 = vld [vmem:[#allocation4 + $0x258] sm:$0xff]  ;;  %v328_v30 = vld [vmem:[#allocation4 + $0x260] sm:$0xff] }
  0x4f   : > { %372 = vmatpush1.msra.mxu0 %v301_v19  ;;  %449 = vmatpush1.msra.mxu1 %v303_v20  ;;  %v326_v31 = vld [vmem:[#allocation4 + $0x250] sm:$0xff]  ;;  %v320_v32 = vld [vmem:[#allocation4 + $0x220] sm:$0xff]  ;;  %v321_v33 = vld [vmem:[#allocation4 + $0x228] sm:$0xff] }
  0x50   : > { %373 = vmatprep.subr.mxu0 %v295_v21  ;;  %450 = vmatprep.subr.mxu1 %v297_v22  ;;  %v319_v34 = vld [vmem:[#allocation4 + $0x218] sm:$0xff]  ;;  %v313_v35 = vld [vmem:[#allocation4 + $0x1e8] sm:$0xff]  ;;  %v314_v36 = vld [vmem:[#allocation4 + $0x1f0] sm:$0xff] }
  0x51   : > { %374 = vmatpush1.msra.mxu0 %v294_v23  ;;  %451 = vmatpush1.msra.mxu1 %v296_v24  ;;  %v312_v38 = vld [vmem:[#allocation4 + $0x1e0] sm:$0xff]  ;;  %v306_v39 = vld [vmem:[#allocation4 + $0x1b0] sm:$0xff]  ;;  %v307_v40 = vld [vmem:[#allocation4 + $0x1b8] sm:$0xff] }
  0x52   : > { %1540 = vmatmul.mubr.msk.f32.vlgmr.msra.gmra.mxu0 %vm336_vm0, %v1538_v25  ;;  %517 = vmatprep.subr.mxu0 %v334_v26  ;;  %v305_v41 = vld [vmem:[#allocation4 + $0x1a8] sm:$0xff]  ;;  %v299_v42 = vld [vmem:[#allocation4 + $0x178] sm:$0xff]  ;;  %v300_v43 = vld [vmem:[#allocation4 + $0x180] sm:$0xff] }
  0x53   : > { %1593 = vmatprep.subr.mxu1 %v335_v27  ;;  %1542 = vmatmul.mubr.msk.f32.vlgmr.msra.gmra.mxu1 %vm336_vm0, %v1538_v25  ;;  %v298_v44 = vld [vmem:[#allocation4 + $0x170] sm:$0xff]  ;;  %v283_v45 = vld [vmem:[#allocation4 + $0x120] sm:$0xff]  ;;  %v282_v47 = vld [vmem:[#allocation4 + $0x118] sm:$0xff] }
  0x54   : > { %518 = vmatpush1.msra.mxu0 %v333_v28  ;;  %1594 = vmatpush3.msra.mxu1 %v335_v27  ;;  %v285_v46 = vld [vmem:[#allocation4 + $0x130] sm:$0xff]  ;;  %v284_v48 = vld [vmem:[#allocation4 + $0x128] sm:$0xff]  ;;  %v278_v50 = vld [vmem:[#allocation4 + $0xf8] sm:$0xff] }
  0x55   : > { %519 = vmatprep.subr.mxu0 %v327_v29  ;;  %1595 = vmatprep.subr.mxu1 %v328_v30  ;;  %v276_v49 = vld [vmem:[#allocation4 + $0xe8] sm:$0xff]  ;;  %v275_v51 = vld [vmem:[#allocation4 + $0xe0] sm:$0xff]  ;;  %v277_v52 = vld [vmem:[#allocation4 + $0xf0] sm:$0xff] }
  0x56   : > { %520 = vmatpush1.msra.mxu0 %v326_v31  ;;  %1596 = vmatpush3.msra.mxu1 %v328_v30  ;;  %v269_v53 = vld [vmem:[#allocation4 + $0xb0] sm:$0xff]  ;;  %v271_v54 = vld [vmem:[#allocation4 + $0xc0] sm:$0xff]  ;;  %v268_v55 = vld [vmem:[#allocation4 + $0xa8] sm:$0xff] }
  0x57   : > { %521 = vmatprep.subr.mxu0 %v320_v32  ;;  %1597 = vmatprep.subr.mxu1 %v321_v33  ;;  %v270_v56 = vld [vmem:[#allocation4 + $0xb8] sm:$0xff]  ;;  %v264_v58 = vld [vmem:[#allocation4 + $0x88] sm:$0xff]  ;;  %v261_v59 = vld [vmem:[#allocation4 + $0x70] sm:$0xff] }
  0x58   : > { %522 = vmatpush1.msra.mxu0 %v319_v34  ;;  %1598 = vmatpush3.msra.mxu1 %v321_v33  ;;  %v262_v57 = vld [vmem:[#allocation4 + $0x78] sm:$0xff]  ;;  %v263_v60 = vld [vmem:[#allocation4 + $0x80] sm:$0xff]  ;;  %v257_v62 = vld [vmem:[#allocation4 + $0x50] sm:$0xff] }
  0x59   : > { %413 = vmatprep.mubr.f32.mxu0 %v1863_v0  ;;  %523 = vmatprep.subr.mxu0 %v313_v35  ;;  %v255_v61 = vld [vmem:[#allocation4 + $0x40] sm:$0xff]  ;;  %v254_v63 = vld [vmem:[#allocation4 + $0x38] sm:$0xff]  ;;  %v256_v1 = vld [vmem:[#allocation4 + $0x48] sm:$0xff] }
  0x5a   : > { %1599 = vmatprep.subr.mxu1 %v314_v36  ;;  %1541 = vmatmul.mubr.msk.f32.gmra.mxu0 %vm336_vm0, %v2003_v37  ;;  %v248_v2 = vld [vmem:[#allocation4 + $0x8] sm:$0xff]  ;;  %v250_v3 = vld [vmem:[#allocation4 + $0x18] sm:$0xff]  ;;  %v247_v4 = vld [vmem:[#allocation4] sm:$0xff] }
  0x5b   : > { %524 = vmatpush1.msra.mxu0 %v312_v38  ;;  %1600 = vmatpush3.msra.mxu1 %v314_v36  ;;  %v249_v5 = vld [vmem:[#allocation4 + $0x10] sm:$0xff]  ;;  %v287_v7 = vld [vmem:[#allocation4 + $0x140] sm:$0xff]  ;;  %v288_v8 = vld [vmem:[#allocation4 + $0x148] sm:$0xff] }
  0x5c   : > { %490 = vmatprep.mubr.f32.mxu1 %v1863_v0  ;;  %525 = vmatprep.subr.mxu0 %v306_v39  ;;  %v245_v6 = vld [vmem:[%s1987_s22] sm:$0xff]  ;;  %v286_v9 = vld [vmem:[#allocation4 + $0x138] sm:$0xff]  ;;  %v280_v10 = vld [vmem:[#allocation4 + $0x108] sm:$0xff] }
  0x5d   : > { %1601 = vmatprep.subr.mxu1 %v307_v40  ;;  %1543 = vmatmul.mubr.msk.f32.gmra.mxu1 %vm336_vm0, %v2003_v37  ;;  %v281_v11 = vld [vmem:[#allocation4 + $0x110] sm:$0xff]  ;;  %v279_v12 = vld [vmem:[#allocation4 + $0x100] sm:$0xff]  ;;  %v246_v13 = vld [vmem:[%s1987_s22 + $0x8] sm:$0x3f] }
  0x5e   : > { %526 = vmatpush1.msra.mxu0 %v305_v41  ;;  %1602 = vmatpush3.msra.mxu1 %v307_v40  ;;  %v273_v14 = vld [vmem:[#allocation4 + $0xd0] sm:$0xff]  ;;  %v274_v15 = vld [vmem:[#allocation4 + $0xd8] sm:$0xff]  ;;  %v272_v16 = vld [vmem:[#allocation4 + $0xc8] sm:$0xff] }
  0x5f   : > { %527 = vmatprep.subr.mxu0 %v299_v42  ;;  %1603 = vmatprep.subr.mxu1 %v300_v43  ;;  %v266_v17 = vld [vmem:[#allocation4 + $0x98] sm:$0xff]  ;;  %v267_v18 = vld [vmem:[#allocation4 + $0xa0] sm:$0xff]  ;;  %v265_v19 = vld [vmem:[#allocation4 + $0x90] sm:$0xff] }
  0x60   : > { %528 = vmatpush1.msra.mxu0 %v298_v44  ;;  %561 = vmatprep.mubr.f32.mxu0 %v1863_v0  ;;  %v259_v20 = vld [vmem:[#allocation4 + $0x60] sm:$0xff]  ;;  %v260_v21 = vld [vmem:[#allocation4 + $0x68] sm:$0xff]  ;;  %v258_v22 = vld [vmem:[#allocation4 + $0x58] sm:$0xff] }
  0x61   : > { %1604 = vmatpush3.msra.mxu1 %v300_v43  ;;  %1544 = vmatmul.mubr.msk.f32.vlgmr.msra.gmra.mxu0 %vm336_vm0, %v1538_v25  ;;  %v252_v23 = vld [vmem:[#allocation4 + $0x28] sm:$0xff]  ;;  %v253_v24 = vld [vmem:[#allocation4 + $0x30] sm:$0xff]  ;;  %v1002_v26 = vld [vmem:[#allocation4 + $0x3c0] sm:$0xff] }
  0x62   : > { %1605 = vmatprep.mubr.msk.f32.mxu1 %vm336_vm0, %v1538_v25  ;;  %675 = vmatprep.subr.mxu0 %v283_v45  ;;  %v251_v25 = vld [vmem:[#allocation4 + $0x20] sm:$0xff]  ;;  %v1004_v27 = vld [vmem:[#allocation4 + $0x3d0] sm:$0xff]  ;;  %v1001_v28 = vld [vmem:[#allocation4 + $0x3b8] sm:$0xff] }
  0x63   : > { %752 = vmatprep.subr.mxu1 %v285_v46  ;;  %1606 = vmatmul.mubr.msk.f32.vlgmr.msra.gmra.mxu1 %vm336_vm0, %v2003_v37  ;;  %v1003_v29 = vld [vmem:[#allocation4 + $0x3c8] sm:$0xff]  ;;  %v997_v31 = vld [vmem:[#allocation4 + $0x398] sm:$0xff]  ;;  %v994_v32 = vld [vmem:[#allocation4 + $0x380] sm:$0xff] }
  0x64   : > { %676 = vmatpush1.msra.mxu0 %v282_v47  ;;  %753 = vmatpush1.msra.mxu1 %v284_v48  ;;  %v995_v30 = vld [vmem:[#allocation4 + $0x388] sm:$0xff]  ;;  %v996_v33 = vld [vmem:[#allocation4 + $0x390] sm:$0xff]  ;;  %v990_v35 = vld [vmem:[#allocation4 + $0x360] sm:$0xff] }
  0x65   : > { %677 = vmatprep.subr.mxu0 %v276_v49  ;;  %754 = vmatprep.subr.mxu1 %v278_v50  ;;  %v988_v34 = vld [vmem:[#allocation4 + $0x350] sm:$0xff]  ;;  %v987_v36 = vld [vmem:[#allocation4 + $0x348] sm:$0xff]  ;;  %v981_v38 = vld [vmem:[#allocation4 + $0x318] sm:$0xff] }
  0x66   : > { %678 = vmatpush1.msra.mxu0 %v275_v51  ;;  %755 = vmatpush1.msra.mxu1 %v277_v52  ;;  %v983_v39 = vld [vmem:[#allocation4 + $0x328] sm:$0xff]  ;;  %v980_v40 = vld [vmem:[#allocation4 + $0x310] sm:$0xff]  ;;  %v982_v41 = vld [vmem:[#allocation4 + $0x320] sm:$0xff] }
  0x67   : > { %679 = vmatprep.subr.mxu0 %v269_v53  ;;  %756 = vmatprep.subr.mxu1 %v271_v54  ;;  %v974_v42 = vld [vmem:[#allocation4 + $0x2e0] sm:$0xff]  ;;  %v976_v43 = vld [vmem:[#allocation4 + $0x2f0] sm:$0xff]  ;;  %v973_v44 = vld [vmem:[#allocation4 + $0x2d8] sm:$0xff] }
  0x68   : > { %680 = vmatpush1.msra.mxu0 %v268_v55  ;;  %757 = vmatpush1.msra.mxu1 %v270_v56  ;;  %v975_v45 = vld [vmem:[#allocation4 + $0x2e8] sm:$0xff]  ;;  %v969_v47 = vld [vmem:[#allocation4 + $0x2b8] sm:$0xff]  ;;  %v966_v48 = vld [vmem:[#allocation4 + $0x2a0] sm:$0xff] }
  0x69   : > { %567 = vmatprep.mubr.f32.mxu0 %v1863_v0  ;;  %681 = vmatprep.subr.mxu0 %v262_v57  ;;  %v967_v46 = vld [vmem:[#allocation4 + $0x2a8] sm:$0xff]  ;;  %v968_v49 = vld [vmem:[#allocation4 + $0x2b0] sm:$0xff]  ;;  %v1006_v51 = vld [vmem:[#allocation4 + $0x3e0] sm:$0xff] }
  0x6a   : > { %758 = vmatprep.subr.mxu1 %v264_v58  ;;  %1545 = vmatmul.mubr.msk.f32.gmra.mxu0 %vm336_vm0, %v2003_v37  ;;  %v989_v37 = vld [vmem:[#allocation4 + $0x358] sm:$0xff]  ;;  %v1007_v52 = vld [vmem:[#allocation4 + $0x3e8] sm:$0xff]  ;;  %v1000_v55 = vld [vmem:[#allocation4 + $0x3b0] sm:$0xff] }
  0x6b   : > { %682 = vmatpush1.msra.mxu0 %v261_v59  ;;  %759 = vmatpush1.msra.mxu1 %v263_v60  ;;  %v1556_v50 = vld [vmem:[%s1987_s22 + $0x2] sm:$0xff]  ;;  %v1557_v57 = vld [vmem:[%s1987_s22 + $0xa] sm:$0x3f] }
  0x6c   : > { %683 = vmatprep.subr.mxu0 %v255_v61  ;;  %760 = vmatprep.subr.mxu1 %v257_v62  ;;  %v1005_v53 = vld [vmem:[#allocation4 + $0x3d8] sm:$0xff]  ;;  %v999_v54 = vld [vmem:[#allocation4 + $0x3a8] sm:$0xff]  ;;  %v998_v56 = vld [vmem:[#allocation4 + $0x3a0] sm:$0xff] }
  0x6d   : > { %684 = vmatpush1.msra.mxu0 %v254_v63  ;;  %761 = vmatpush1.msra.mxu1 %v256_v1  ;;  %v992_v58 = vld [vmem:[#allocation4 + $0x370] sm:$0xff]  ;;  %v993_v59 = vld [vmem:[#allocation4 + $0x378] sm:$0xff]  ;;  %v991_v60 = vld [vmem:[#allocation4 + $0x368] sm:$0xff] }
  0x6e   : > { %685 = vmatprep.subr.mxu0 %v248_v2  ;;  %762 = vmatprep.subr.mxu1 %v250_v3  ;;  %v985_v61 = vld [vmem:[#allocation4 + $0x338] sm:$0xff]  ;;  %v986_v62 = vld [vmem:[#allocation4 + $0x340] sm:$0xff]  ;;  %v984_v63 = vld [vmem:[#allocation4 + $0x330] sm:$0xff] }
  0x6f   : > { %686 = vmatpush1.msra.mxu0 %v247_v4  ;;  %719 = vmatprep.mubr.f32.mxu0 %v1863_v0  ;;  %v978_v1 = vld [vmem:[#allocation4 + $0x300] sm:$0xff]  ;;  %v979_v2 = vld [vmem:[#allocation4 + $0x308] sm:$0xff]  ;;  %v977_v3 = vld [vmem:[#allocation4 + $0x2f8] sm:$0xff] }
  0x70   : > { %763 = vmatpush1.msra.mxu1 %v249_v5  ;;  %796 = vmatprep.mubr.f32.mxu1 %v1863_v0  ;;  %v971_v4 = vld [vmem:[#allocation4 + $0x2c8] sm:$0xff]  ;;  %v972_v5 = vld [vmem:[#allocation4 + $0x2d0] sm:$0xff] }
  0x71   : > { %1548 = vmatmul.mubr.msk.f32.vlgmr.msra.gmra.mxu0 %vm336_vm0, %v245_v6  ;;  %1550 = vmatmul.mubr.msk.f32.vlgmr.msra.gmra.mxu1 %vm336_vm0, %v245_v6 }
  0x72   : > { %829 = vmatprep.subr.mxu0 %v287_v7  ;;  %1608 = vmatprep.subr.mxu1 %v288_v8 }
  0x73   : > { %830 = vmatpush1.msra.mxu0 %v286_v9  ;;  %1609 = vmatpush3.msra.mxu1 %v288_v8 }
  0x74   : > { %831 = vmatprep.subr.mxu0 %v280_v10  ;;  %1610 = vmatprep.subr.mxu1 %v281_v11 }
  0x75   : > { %725 = vmatprep.mubr.f32.mxu0 %v1863_v0  ;;  %802 = vmatprep.mubr.f32.mxu1 %v1863_v0 }
  0x76   : > { %832 = vmatpush1.msra.mxu0 %v279_v12  ;;  %1611 = vmatpush3.msra.mxu1 %v281_v11 }
  0x77   : > { %1549 = vmatmul.mubr.msk.f32.gmra.mxu0 %vm336_vm0, %v246_v13  ;;  %1551 = vmatmul.mubr.msk.f32.gmra.mxu1 %vm336_vm0, %v246_v13 }
  0x78   : > { %833 = vmatprep.subr.mxu0 %v273_v14  ;;  %1612 = vmatprep.subr.mxu1 %v274_v15 }
  0x79   : > { %834 = vmatpush1.msra.mxu0 %v272_v16  ;;  %1613 = vmatpush3.msra.mxu1 %v274_v15 }
  0x7a   : > { %835 = vmatprep.subr.mxu0 %v266_v17  ;;  %1614 = vmatprep.subr.mxu1 %v267_v18 }
  0x7b   : > { %836 = vmatpush1.msra.mxu0 %v265_v19  ;;  %1615 = vmatpush3.msra.mxu1 %v267_v18 }
  0x7c   : > { %837 = vmatprep.subr.mxu0 %v259_v20  ;;  %1616 = vmatprep.subr.mxu1 %v260_v21 }
  0x7d   : > { %838 = vmatpush1.msra.mxu0 %v258_v22  ;;  %1617 = vmatpush3.msra.mxu1 %v260_v21 }
  0x7e   : > { %839 = vmatprep.subr.mxu0 %v252_v23  ;;  %1618 = vmatprep.subr.mxu1 %v253_v24 }
  0x7f   : > { %840 = vmatpush1.msra.mxu0 %v251_v25  ;;  %873 = vmatprep.mubr.f32.mxu0 %v1863_v0 }
  0x80   : > { %1619 = vmatpush3.msra.mxu1 %v253_v24  ;;  %1620 = vmatprep.mubr.msk.f32.mxu1 %vm336_vm0, %v245_v6 }
  0x81   : > { %1552 = vmatmul.mubr.msk.f32.vlgmr.msra.gmra.mxu0 %vm336_vm0, %v245_v6  ;;  %1621 = vmatmul.mubr.msk.f32.vlgmr.msra.gmra.mxu1 %vm336_vm0, %v246_v13  ;;  %v970_v6 = vld [vmem:[#allocation4 + $0x2c0] sm:$0xff] }
  0x82   : > { %1034 = vmatprep.subr.mxu0 %v1002_v26  ;;  %1111 = vmatprep.subr.mxu1 %v1004_v27  ;;  %v1336_v27 = vlaneseq }
  0x83   : > { %1035 = vmatpush1.msra.mxu0 %v1001_v28  ;;  %1112 = vmatpush1.msra.mxu1 %v1003_v29 }
  0x84   : > { %1036 = vmatprep.subr.mxu0 %v995_v30  ;;  %1113 = vmatprep.subr.mxu1 %v997_v31  ;;  %v2068_v30 = vshrl.u32 %v1336_v27, 7 }
  0x85   : > { %879 = vmatprep.mubr.f32.mxu0 %v1863_v0  ;;  %1037 = vmatpush1.msra.mxu0 %v994_v32 }
  0x86   : > { %1114 = vmatpush1.msra.mxu1 %v996_v33  ;;  %1553 = vmatmul.mubr.msk.f32.gmra.mxu0 %vm336_vm0, %v246_v13 }
  0x87   : > { %1038 = vmatprep.subr.mxu0 %v988_v34  ;;  %1115 = vmatprep.subr.mxu1 %v990_v35  ;;  %v1338_v34 = vsub.s32 0, %v2068_v30  ;;  %v1346_v35 = vsub.s32 2, %v2068_v30 }
  0x88   : > { %1039 = vmatpush1.msra.mxu0 %v987_v36  ;;  %1116 = vmatpush1.msra.mxu1 %v989_v37  ;;  %v1334_v36 = vld [vmem:[#allocation6] sm:$0xff]  ;;  %v1342_v37 = vsub.s32 1, %v2068_v30 }
  0x89   : > { %1040 = vmatprep.subr.mxu0 %v981_v38  ;;  %1117 = vmatprep.subr.mxu1 %v983_v39  ;;  %v1350_v38 = vsub.s32 3, %v2068_v30 }
  0x8a   : > { %1041 = vmatpush1.msra.mxu0 %v980_v40  ;;  %1118 = vmatpush1.msra.mxu1 %v982_v41 }
  0x8b   : > { %1042 = vmatprep.subr.mxu0 %v974_v42  ;;  %1119 = vmatprep.subr.mxu1 %v976_v43  ;;  %v1339_v43 = vrot.slane %v1334_v36, %v1338_v34 }
  0x8c   : > { %1043 = vmatpush1.msra.mxu0 %v973_v44  ;;  %1120 = vmatpush1.msra.mxu1 %v975_v45  ;;  %v1347_v44 = vrot.slane %v1334_v36, %v1346_v35 }
  0x8d   : > { %1044 = vmatprep.subr.mxu0 %v967_v46  ;;  %1121 = vmatprep.subr.mxu1 %v969_v47  ;;  %v1343_v47 = vrot.slane %v1334_v36, %v1342_v37 }
  0x8e   : > { %1045 = vmatpush1.msra.mxu0 %v966_v48  ;;  %1078 = vmatprep.mubr.f32.mxu0 %v1863_v0  ;;  %v1351_v48 = vrot.slane %v1334_v36, %v1350_v38 }
  0x8f   : > { %1122 = vmatpush1.msra.mxu1 %v968_v49  ;;  %1155 = vmatprep.mubr.f32.mxu1 %v1863_v0 }
  0x90   : > { %1558 = vmatmul.mubr.msk.f32.vlgmr.msra.gmra.mxu0 %vm336_vm0, %v1556_v50  ;;  %1560 = vmatmul.mubr.msk.f32.vlgmr.msra.gmra.mxu1 %vm336_vm0, %v1556_v50 }
  0x91   : > { %1188 = vmatprep.subr.mxu0 %v1006_v51  ;;  %1623 = vmatprep.subr.mxu1 %v1007_v52 }
  0x92   : > { %1189 = vmatpush1.msra.mxu0 %v1005_v53  ;;  %1624 = vmatpush3.msra.mxu1 %v1007_v52 }
  0x93   : > { %1190 = vmatprep.subr.mxu0 %v999_v54  ;;  %1625 = vmatprep.subr.mxu1 %v1000_v55 }
  0x94   : > { %1084 = vmatprep.mubr.f32.mxu0 %v1863_v0  ;;  %1161 = vmatprep.mubr.f32.mxu1 %v1863_v0 }
  0x95   : > { %1191 = vmatpush1.msra.mxu0 %v998_v56  ;;  %1626 = vmatpush3.msra.mxu1 %v1000_v55 }
  0x96   : > { %1559 = vmatmul.mubr.msk.f32.gmra.mxu0 %vm336_vm0, %v1557_v57  ;;  %1561 = vmatmul.mubr.msk.f32.gmra.mxu1 %vm336_vm0, %v1557_v57 }
  0x97   : > { %1192 = vmatprep.subr.mxu0 %v992_v58  ;;  %1627 = vmatprep.subr.mxu1 %v993_v59 }
  0x98   : > { %1193 = vmatpush1.msra.mxu0 %v991_v60  ;;  %1628 = vmatpush3.msra.mxu1 %v993_v59 }
  0x99   : > { %1194 = vmatprep.subr.mxu0 %v985_v61  ;;  %1629 = vmatprep.subr.mxu1 %v986_v62 }
  0x9a   : > { %1195 = vmatpush1.msra.mxu0 %v984_v63  ;;  %1630 = vmatpush3.msra.mxu1 %v986_v62 }
  0x9b   : > { %1196 = vmatprep.subr.mxu0 %v978_v1  ;;  %1631 = vmatprep.subr.mxu1 %v979_v2 }
  0x9c   : > { %1197 = vmatpush1.msra.mxu0 %v977_v3  ;;  %1632 = vmatpush3.msra.mxu1 %v979_v2 }
  0x9d   : > { %1198 = vmatprep.subr.mxu0 %v971_v4  ;;  %1633 = vmatprep.subr.mxu1 %v972_v5 }
  0x9e   : > { %1199 = vmatpush1.msra.mxu0 %v970_v6  ;;  %1232 = vmatprep.mubr.f32.mxu0 %v1863_v0 }
  0x9f   : > { %1634 = vmatpush3.msra.mxu1 %v972_v5  ;;  %1635 = vmatprep.mubr.msk.f32.mxu1 %vm336_vm0, %v1556_v50 }
  0xa0   : > { %1562 = vmatmul.mubr.msk.f32.vlgmr.msra.gmra.mxu0 %vm336_vm0, %v1556_v50  ;;  %1636 = vmatmul.mubr.msk.f32.vlgmr.msra.gmra.mxu1 %vm336_vm0, %v1557_v57 }
  0xa1   : > { %1238 = vmatprep.mubr.f32.mxu0 %v1863_v0 }
  0xa4   : > { %1563 = vmatmul.mubr.msk.f32.gmra.mxu0 %vm336_vm0, %v1557_v57 }
 0x112   : > { %v409_v7 = vpop.f32.mrf.mxu0 }
 0x113   : > { %v486_v12 = vpop.f32.mrf.mxu1 }
 0x114   : > { %v411_v8 = vpop.f32.mrf.mxu0 }
 0x115   : > { %v488_v14 = vpop.f32.mrf.mxu1 }
 0x11a   : > { %v415_v9 = vpop.f32.mrf.mxu0 }
 0x11c   : > { %v417_v10 = vpop.f32.mrf.mxu0 }
 0x11d   : > { %v492_v16 = vpop.f32.mrf.mxu1 }
 0x11f   : > { %v494_v18 = vpop.f32.mrf.mxu1 }
 0x121   : > { %v2051_v11 = vpop.f32.mrf.mxu0 }
 0x123   : > { %v2053_v13 = vpop.f32.mrf.mxu0  ;;  %v2059_v19 = vpop.f32.mrf.mxu1 }
 0x125   : > { %v2061_v21 = vpop.f32.mrf.mxu1 }
 0x12a   : > { %v2055_v15 = vpop.f32.mrf.mxu0 }
 0x12c   : > { %v2057_v17 = vpop.f32.mrf.mxu0 }
 0x131   : > { %v721_v0 = vpop.f32.mrf.mxu0  ;;  %v798_v22 = vpop.f32.mrf.mxu1 }
 0x132   : > { %v722_v41 = vadd.f32 %v721_v0, %v409_v7  ;;  %v799_v42 = vadd.f32 %v798_v22, %v486_v12 }
 0x133   : > { %v723_v20 = vpop.f32.mrf.mxu0  ;;  %v800_v24 = vpop.f32.mrf.mxu1 }
 0x134   : > { %v724_v49 = vadd.f32 %v723_v20, %v411_v8  ;;  %v801_v50 = vadd.f32 %v800_v24, %v488_v14  ;;  %v1354_v20 = vsub.s32 4, %v2068_v30 }
 0x136   : > { %v1355_v24 = vrot.slane %v1334_v36, %v1354_v20 }
 0x137   : > { %v727_v23 = vpop.f32.mrf.mxu0  ;;  %v804_v28 = vpop.f32.mrf.mxu1 }
 0x138   : > { %v728_v59 = vadd.f32 %v727_v23, %v415_v9  ;;  %v805_v60 = vadd.f32 %v804_v28, %v492_v16 }
 0x139   : > { %v729_v25 = vpop.f32.mrf.mxu0  ;;  %v806_v31 = vpop.f32.mrf.mxu1 }
 0x13a   : > { %v730_v2 = vadd.f32 %v729_v25, %v417_v10  ;;  %v807_v3 = vadd.f32 %v806_v31, %v494_v18  ;;  %v1362_v10 = vsub.s32 6, %v2068_v30  ;;  %v1358_v18 = vsub.s32 5, %v2068_v30 }
 0x13c   : > { %v1363_v25 = vrot.slane %v1334_v36, %v1362_v10  ;;  %v1359_v31 = vrot.slane %v1334_v36, %v1358_v18 }
 0x141   : > { %v2063_v26 = vpop.f32.mrf.mxu0  ;;  %v1622_v32 = vpop.f32.mrf.mxu1 }
 0x142   : > { %v876_v22 = vadd.f32 %v2063_v26, %v2051_v11  ;;  %v958_v23 = vadd.f32 %v1622_v32, %v2059_v19 }
 0x143   : > { %v2065_v29 = vpop.f32.mrf.mxu0  ;;  %v952_v39 = vpop.f32.mrf.mxu1 }
 0x144   : > { %v878_v34 = vadd.f32 %v2065_v29, %v2053_v13  ;;  %v953_v35 = vadd.f32 %v952_v39, %v2061_v21 }
 0x146   : > { %v2070_v33 = vpop.f32.mrf.mxu0 }
 0x147   : > { %v882_v11 = vadd.f32 %v2070_v33, %v2055_v15 }
 0x148   : > { %v2077_v40 = vpop.f32.mrf.mxu0 }
 0x149   : > { %v884_v13 = vadd.f32 %v2077_v40, %v2057_v17 }
 0x150   : > { %v1080_v45 = vpop.f32.mrf.mxu0  ;;  %v1157_v46 = vpop.f32.mrf.mxu1 }
 0x151   : > { %v1320_v51 = vadd.f32 %v1080_v45, %v722_v41  ;;  %v1322_v52 = vadd.f32 %v1157_v46, %v799_v42 }
 0x152   : > { %v1082_v53 = vpop.f32.mrf.mxu0  ;;  %v1159_v54 = vpop.f32.mrf.mxu1 }
 0x153   : > { %v1371_v55 = vadd.f32 %v1339_v43, %v1320_v51  ;;  %v1373_v56 = vadd.f32 %v1347_v44, %v1322_v52  ;;  %v1321_v57 = vadd.f32 %v1082_v53, %v724_v49  ;;  %v1323_v58 = vadd.f32 %v1159_v54, %v801_v50 }
 0x155   : > { %1385 = vst [vmem:[%s2082_s24] sm:$0xff] %v1371_v55  ;;  %1387 = vst [vmem:[%s2082_s24 + $0x10] sm:$0xff] %v1373_v56  ;;  %v1372_v61 = vadd.f32 %v1343_v47, %v1321_v57  ;;  %v1374_v62 = vadd.f32 %v1351_v48, %v1323_v58 }
 0x156   : > { %v1086_v63 = vpop.f32.mrf.mxu0  ;;  %v1163_v1 = vpop.f32.mrf.mxu1 }
 0x157   : > { %1386 = vst [vmem:[%s2082_s24 + $0x8] sm:$0xff] %v1372_v61  ;;  %1388 = vst [vmem:[%s2082_s24 + $0x18] sm:$0xff] %v1374_v62  ;;  %v1327_v4 = vadd.f32 %v1086_v63, %v728_v59  ;;  %v1329_v5 = vadd.f32 %v1163_v1, %v805_v60 }
 0x158   : > { %v1088_v6 = vpop.f32.mrf.mxu0  ;;  %v1165_v7 = vpop.f32.mrf.mxu1 }
 0x159   : > { %v1378_v8 = vadd.f32 %v1339_v43, %v1327_v4  ;;  %v1380_v9 = vadd.f32 %v1347_v44, %v1329_v5  ;;  %v1328_v12 = vadd.f32 %v1088_v6, %v730_v2  ;;  %v1330_v14 = vadd.f32 %v1165_v7, %v807_v3 }
 0x15b   : > { %1392 = vst [vmem:[%s2082_s24 + $0x38] sm:$0x3f] %v1378_v8  ;;  %1394 = vst [vmem:[%s2082_s24 + $0x48] sm:$0x3f] %v1380_v9  ;;  %v1379_v16 = vadd.f32 %v1343_v47, %v1328_v12  ;;  %v1381_v0 = vadd.f32 %v1351_v48, %v1330_v14 }
 0x15d   : > { %1393 = vst [vmem:[%s2082_s24 + $0x40] sm:$0x3f] %v1379_v16  ;;  %1395 = vst [vmem:[%s2082_s24 + $0x50] sm:$0x3f] %v1381_v0 }
 0x160   : > { %v1234_v27 = vpop.f32.mrf.mxu0  ;;  %v1637_v28 = vpop.f32.mrf.mxu1 }
 0x161   : > { %v1324_v30 = vadd.f32 %v1234_v27, %v876_v22  ;;  %v1333_v37 = vadd.f32 %v1637_v28, %v958_v23 }
 0x162   : > { %v1236_v19 = vpop.f32.mrf.mxu0  ;;  %v1311_v26 = vpop.f32.mrf.mxu1 }
 0x163   : > { %v1375_v32 = vadd.f32 %v1355_v24, %v1324_v30  ;;  %v1384_v38 = vadd.f32 %v1363_v25, %v1333_v37  ;;  %v1325_v41 = vadd.f32 %v1236_v19, %v878_v34  ;;  %v1326_v36 = vadd.f32 %v1311_v26, %v953_v35 }
 0x164   : > { %v1240_v42 = vpop.f32.mrf.mxu0 }
 0x165   : > { %1389 = vst [vmem:[%s2082_s24 + $0x20] sm:$0xff] %v1375_v32  ;;  %1398 = vst [vmem:[%s2082_s24 + $0x68] sm:$0x3f] %v1384_v38  ;;  %v1376_v21 = vadd.f32 %v1359_v31, %v1325_v41  ;;  %v1377_v29 = vadd.f32 %v1363_v25, %v1326_v36  ;;  %v1331_v39 = vadd.f32 %v1240_v42, %v882_v11 }
 0x166   : > { %v1242_v43 = vpop.f32.mrf.mxu0 }
 0x167   : > { %1390 = vst [vmem:[%s2082_s24 + $0x28] sm:$0xff] %v1376_v21  ;;  %1391 = vst [vmem:[%s2082_s24 + $0x30] sm:$0xff] %v1377_v29  ;;  %v1382_v15 = vadd.f32 %v1355_v24, %v1331_v39  ;;  %v1332_v33 = vadd.f32 %v1242_v43, %v884_v13 }
 0x169   : > { %1396 = vst [vmem:[%s2082_s24 + $0x58] sm:$0x3f] %v1382_v15  ;;  %v1383_v44 = vadd.f32 %v1359_v31, %v1332_v33 }
 0x16b   : > { %1397 = vst [vmem:[%s2082_s24 + $0x60] sm:$0x3f] %v1383_v44 }
 0x16c PF: > { %s17_s17 = sadd.s32 1, %s1854_s17   ;;  %s2138_s12 = smov %s1838_s13 }
 0x16d   : > { %p14_p4 = scmp.ge.s32.totalorder %s17_s17, 4   ;;  %s2139_s13 = smov %s1842_s14 }
 0x16e   : > { %s2140_s14 = smov %s1969_s23  ;;  %s2141_s15 = smov %s1850_s16 }
 0x16f   : > { %s2142_s16 = smov %s2144_s9  ;;  %16 = sbr.rel (!%p14_p4) target bundleno = 5 (0x5), region = 85 }
 0x174   :  { %1431 = vsyncpa [#allocation3], 1 }
 0x175   :  { %1433 = vsyncpa [#allocation3 + $0x1], 1 }
 0x176   :  { %1434 = vsyncpa [#allocation5], 1 }

</bundles_post_ra>
